<compile_context>
chip_gen: v5e
topology: v5e:2x2
jax: 0.10.0
libtpu: 0.0.40
codegen_flags: <defaults>
</compile_context>

<pallas_src>
import math

import jax
import jax.numpy as jnp
from jax.experimental import pallas as pl
from jax.experimental.pallas import tpu as pltpu


# ---------------------------------------------------------------------------
# Problem configuration (mirrors args of the PyTorch module __init__)
# ---------------------------------------------------------------------------
N_AGENTS = 4
CENTRAL_ACTION_EMBED = 1
STATE_SHAPE = (16,)                                   # args.state_shape
STATE_DIM = math.prod(STATE_SHAPE)                    # 16
QS_DIM = N_AGENTS * CENTRAL_ACTION_EMBED              # 4
INPUT_DIM = QS_DIM + STATE_DIM                        # 20
EMBED_DIM = 32                                        # args.central_mixing_embed_dim
PACKED_DIM = 2 * EMBED_DIM                            # adv + V layer-1 fused: 64

TILE_N = 4096                                         # max rows (lanes) per grid step


def _round_up(x, m):
    return ((x + m - 1) // m) * m


# ---------------------------------------------------------------------------
# Pallas kernel: one row tile of the fused (adv | V) MLP, transposed layout
# ---------------------------------------------------------------------------
def mixer_kernel(xs_ref, xq_ref, w1s_ref, w1q_ref, w2_ref, w3_ref,
                 wa_ref, wv_ref, b1_ref, b2_ref, b3_ref, bf_ref, out_ref):
    # Rows -> lanes: transpose the row-major input tiles on the XLU so all
    # subsequent VPU work and the final store are lane-dense.
    xsT = xs_ref[...].T                                   # (16, T) f32
    xqT = xq_ref[...].T                                   # (4,  T) f32

    # Fused layer 1 for both branches: rows [0:32] = adv net, [32:64] = V net
    # (the V half of the agent-q weight block is zero).
    h = jnp.dot(w1s_ref[...], xsT, preferred_element_type=jnp.float32)
    h = h + jnp.dot(w1q_ref[...], xqT, preferred_element_type=jnp.float32)
    h = jnp.maximum(h + b1_ref[...], 0.0)                 # (64, T)

    ha = h[:EMBED_DIM, :]                                 # adv branch (32, T)
    hv = h[EMBED_DIM:, :]                                 # V branch   (32, T)

    # V head straight after its single hidden layer (as in the module).
    v = jnp.dot(wv_ref[...], hv, preferred_element_type=jnp.float32)      # (1, T)

    # adv branch: two more 32-wide hidden layers + head.
    ha = jnp.maximum(
        jnp.dot(w2_ref[...], ha, preferred_element_type=jnp.float32) + b2_ref[...],
        0.0)
    ha = jnp.maximum(
        jnp.dot(w3_ref[...], ha, preferred_element_type=jnp.float32) + b3_ref[...],
        0.0)
    adv = jnp.dot(wa_ref[...], ha, preferred_element_type=jnp.float32)    # (1, T)

    # q_tot = adv + v + (b4 + vb2); pre-summed scalar bias lives in SMEM.
    out_ref[...] = (adv + v + bf_ref[0, 0]).astype(out_ref.dtype)         # (1, T)


def _full_spec(a):
    nd = a.ndim
    return pl.BlockSpec(a.shape, lambda i: (0,) * nd)


# ---------------------------------------------------------------------------
# Parameter packing: transposed weights, adv/V layer 1 fused, biases as cols
# ---------------------------------------------------------------------------
def pack_params(params):
    (w1, b1, w2, b2, w3, b3, w4, b4, vw1, vb1, vw2, vb2) = params
    E = EMBED_DIM
    f32 = jnp.float32

    # Input order matches torch.cat([states, agent_qs], dim=1).
    w1s = jnp.zeros((PACKED_DIM, STATE_DIM), f32)
    w1s = w1s.at[:E, :].set(w1[:STATE_DIM, :].T)          # adv layer1, state part
    w1s = w1s.at[E:, :].set(vw1.T)                        # V   layer1 (states only)
    w1q = jnp.zeros((PACKED_DIM, QS_DIM), f32)
    w1q = w1q.at[:E, :].set(w1[STATE_DIM:, :].T)          # adv layer1, agent-q part
    b1p = jnp.concatenate([b1, vb1]).reshape(PACKED_DIM, 1).astype(f32)

    w2T = w2.T.astype(f32)                                # (32, 32)
    w3T = w3.T.astype(f32)                                # (32, 32)
    b2p = b2.reshape(E, 1).astype(f32)
    b3p = b3.reshape(E, 1).astype(f32)

    waT = w4.T.reshape(1, E).astype(f32)                  # adv head (1, 32)
    wvT = vw2.T.reshape(1, E).astype(f32)                 # V   head (1, 32)
    bfp = (b4.reshape(()) + vb2.reshape(())).reshape(1, 1).astype(f32)    # scalar

    return w1s, w1q, w2T, w3T, waT, wvT, b1p, b2p, b3p, bfp


# ---------------------------------------------------------------------------
# Wrapper
# ---------------------------------------------------------------------------
@jax.jit
def multi_head_qmixer_central_ff(agent_qs, states, params):
    """Pallas-backed forward of MultiHeadQMixerCentralFF.

    agent_qs: (bs, T, n_agents, central_action_embed)
    states:   (bs, T, *state_shape)
    returns:  q_tot of shape (bs, T, 1), float32
    """
    bs = agent_qs.shape[0]
    s2d = states.reshape(-1, STATE_DIM).astype(jnp.float32)
    q2d = agent_qs.reshape(-1, QS_DIM).astype(jnp.float32)
    n = s2d.shape[0]

    # Largest lane tile <= TILE_N; fewer, bigger grid steps amortize the fixed
    # per-step overhead.  Large n still yields many "parallel" steps (megacore).
    tile_n = min(TILE_N, _round_up(max(n, 1), 128))
    num_tiles = -(-n // tile_n)
    n_pad = num_tiles * tile_n

    # Zero row-pad so every block exactly tiles the inputs (pad rows give
    # garbage output lanes that are sliced off below).
    if n_pad != n:
        s2d = jnp.pad(s2d, ((0, n_pad - n), (0, 0)))
        q2d = jnp.pad(q2d, ((0, n_pad - n), (0, 0)))

    (w1s, w1q, w2T, w3T, waT, wvT, b1p, b2p, b3p, bfp) = pack_params(params)

    grid = (num_tiles,)
    in_specs = [
        pl.BlockSpec((tile_n, STATE_DIM), lambda i: (i, 0)),   # states tile
        pl.BlockSpec((tile_n, QS_DIM), lambda i: (i, 0)),      # agent-q tile
        _full_spec(w1s), _full_spec(w1q), _full_spec(w2T), _full_spec(w3T),
        _full_spec(waT), _full_spec(wvT),
        _full_spec(b1p), _full_spec(b2p), _full_spec(b3p),
        pl.BlockSpec(memory_space=pltpu.MemorySpace.SMEM),     # fused scalar bias
    ]
    out_spec = pl.BlockSpec((1, tile_n), lambda i: (0, i))     # lane-dense output

    y = pl.pallas_call(
        mixer_kernel,
        out_shape=jax.ShapeDtypeStruct((1, n_pad), jnp.float32),
        grid_spec=pltpu.PrefetchScalarGridSpec(
            num_scalar_prefetch=0,
            grid=grid,
            in_specs=in_specs,
            out_specs=out_spec,
        ),
        compiler_params=pltpu.CompilerParams(
            dimension_semantics=("parallel",),
            vmem_limit_bytes=32 * 1024 * 1024),
    )(s2d, q2d, w1s, w1q, w2T, w3T, waT, wvT, b1p, b2p, b3p, bfp)

    return y[0, :n].reshape(bs, -1, 1)


# ---------------------------------------------------------------------------
# Deterministic parameter init (PyTorch Linear-style uniform bounds)
# ---------------------------------------------------------------------------
def init_params(key):
    def linear(k, fan_in, fan_out):
        kw, kb = jax.random.split(k)
        bound = 1.0 / jnp.sqrt(fan_in)
        w = jax.random.uniform(kw, (fan_in, fan_out), jnp.float32, -bound, bound)
        b = jax.random.uniform(kb, (fan_out,), jnp.float32, -bound, bound)
        return w, b

    ks = jax.random.split(key, 6)
    w1, b1 = linear(ks[0], INPUT_DIM, EMBED_DIM)
    w2, b2 = linear(ks[1], EMBED_DIM, EMBED_DIM)
    w3, b3 = linear(ks[2], EMBED_DIM, EMBED_DIM)
    w4, b4 = linear(ks[3], EMBED_DIM, 1)
    vw1, vb1 = linear(ks[4], STATE_DIM, EMBED_DIM)
    vw2, vb2 = linear(ks[5], EMBED_DIM, 1)
    return (w1, b1, w2, b2, w3, b3, w4, b4, vw1, vb1, vw2, vb2)


def reference_forward(agent_qs, states, params):
    """Pure-JAX f32 reference with the exact semantics of the PyTorch module."""
    (w1, b1, w2, b2, w3, b3, w4, b4, vw1, vb1, vw2, vb2) = params
    bs = agent_qs.shape[0]

    s = states.reshape(-1, STATE_DIM).astype(jnp.float32)
    q = agent_qs.reshape(-1, QS_DIM).astype(jnp.float32)
    x = jnp.concatenate([s, q], axis=1)                   # torch.cat([states, qs])

    h = jax.nn.relu(x @ w1 + b1)
    h = jax.nn.relu(h @ w2 + b2)
    h = jax.nn.relu(h @ w3 + b3)
    adv = h @ w4 + b4

    hv = jax.nn.relu(s @ vw1 + vb1)
    v = hv @ vw2 + vb2
    return (adv + v).reshape(bs, -1, 1)


if __name__ == "__main__":
    key = jax.random.PRNGKey(0)
    kp, kq, ks = jax.random.split(key, 3)

    bs, T = 2, 4
    agent_qs = jax.random.normal(kq, (bs, T, N_AGENTS, CENTRAL_ACTION_EMBED),
                                 jnp.float32)
    states = jax.random.normal(ks, (bs, T) + STATE_SHAPE, jnp.float32)
    params = init_params(kp)

    q_tot = multi_head_qmixer_central_ff(agent_qs, states, params)
    q_tot = jax.block_until_ready(q_tot)

    ref = reference_forward(agent_qs, states, params)
    assert q_tot.shape == (bs, T, 1), q_tot.shape
    assert jnp.allclose(q_tot, ref, atol=5e-3, rtol=5e-3), (
        float(jnp.max(jnp.abs(q_tot - ref))))

    print("KERNEL_OK")
</pallas_src>

<mosaic_0001>
module attributes {stable_mosaic.version = 11 : i64} {
  func.func @mixer_kernel(%arg0: i32, %arg1: memref<128x16xf32, #tpu.memory_space<vmem>>, %arg2: memref<128x4xf32, #tpu.memory_space<vmem>>, %arg3: memref<64x16xf32, #tpu.memory_space<vmem>>, %arg4: memref<64x4xf32, #tpu.memory_space<vmem>>, %arg5: memref<32x32xf32, #tpu.memory_space<vmem>>, %arg6: memref<32x32xf32, #tpu.memory_space<vmem>>, %arg7: memref<1x32xf32, #tpu.memory_space<vmem>>, %arg8: memref<1x32xf32, #tpu.memory_space<vmem>>, %arg9: memref<64x1xf32, #tpu.memory_space<vmem>>, %arg10: memref<32x1xf32, #tpu.memory_space<vmem>>, %arg11: memref<32x1xf32, #tpu.memory_space<vmem>>, %arg12: memref<1x1xf32, #tpu.memory_space<smem>>, %arg13: memref<1x128xf32, #tpu.memory_space<vmem>>) attributes {dimension_semantics = [#tpu.dimension_semantics<parallel>], iteration_bounds = array<i64: 1>, scalar_prefetch = 0 : i64, scratch_operands = 0 : i64, tpu.core_type = #tpu.core_type<tc>, window_params = [{transform_indices = @transform_0, window_bounds = array<i64: 128, 16>}, {transform_indices = @transform_1, window_bounds = array<i64: 128, 4>}, {pipeline_mode = #tpu.pipeline_mode<synchronous>, transform_indices = @transform_2, window_bounds = array<i64: 64, 16>}, {pipeline_mode = #tpu.pipeline_mode<synchronous>, transform_indices = @transform_3, window_bounds = array<i64: 64, 4>}, {pipeline_mode = #tpu.pipeline_mode<synchronous>, transform_indices = @transform_4, window_bounds = array<i64: 32, 32>}, {pipeline_mode = #tpu.pipeline_mode<synchronous>, transform_indices = @transform_5, window_bounds = array<i64: 32, 32>}, {pipeline_mode = #tpu.pipeline_mode<synchronous>, transform_indices = @transform_6, window_bounds = array<i64: 1, 32>}, {pipeline_mode = #tpu.pipeline_mode<synchronous>, transform_indices = @transform_7, window_bounds = array<i64: 1, 32>}, {pipeline_mode = #tpu.pipeline_mode<synchronous>, transform_indices = @transform_8, window_bounds = array<i64: 64, 1>}, {pipeline_mode = #tpu.pipeline_mode<synchronous>, transform_indices = @transform_9, window_bounds = array<i64: 32, 1>}, {pipeline_mode = #tpu.pipeline_mode<synchronous>, transform_indices = @transform_10, window_bounds = array<i64: 32, 1>}, {transform_indices = @transform_11, window_bounds = array<i64: 1, 1>}, {transform_indices = @transform_12, window_bounds = array<i64: 1, 128>}]} {
    %c0 = arith.constant 0 : index
    %c0_0 = arith.constant 0 : index
    %0 = vector.load %arg1[%c0, %c0_0] : memref<128x16xf32, #tpu.memory_space<vmem>>, vector<128x16xf32>
    %1 = tpu.transpose %0, [1, 0] : vector<128x16xf32> -> vector<16x128xf32>
    %c0_1 = arith.constant 0 : index
    %c0_2 = arith.constant 0 : index
    %2 = vector.load %arg2[%c0_1, %c0_2] : memref<128x4xf32, #tpu.memory_space<vmem>>, vector<128x4xf32>
    %3 = tpu.transpose %2, [1, 0] : vector<128x4xf32> -> vector<4x128xf32>
    %c0_3 = arith.constant 0 : index
    %c0_4 = arith.constant 0 : index
    %4 = vector.load %arg3[%c0_3, %c0_4] : memref<64x16xf32, #tpu.memory_space<vmem>>, vector<64x16xf32>
    %cst = arith.constant dense<0.000000e+00> : vector<64x128xf32>
    %5 = tpu.matmul %4, %1, %cst {dimension_numbers = #tpu.dot_dimension_numbers<[1], [0], [0], [1], [0, 0, 1, 1], [], []>} : vector<64x16xf32>, vector<16x128xf32>, vector<64x128xf32> -> vector<64x128xf32>
    %c0_5 = arith.constant 0 : index
    %c0_6 = arith.constant 0 : index
    %6 = vector.load %arg4[%c0_5, %c0_6] : memref<64x4xf32, #tpu.memory_space<vmem>>, vector<64x4xf32>
    %cst_7 = arith.constant dense<0.000000e+00> : vector<64x128xf32>
    %7 = tpu.matmul %6, %3, %cst_7 {dimension_numbers = #tpu.dot_dimension_numbers<[1], [0], [0], [1], [0, 0, 1, 1], [], []>} : vector<64x4xf32>, vector<4x128xf32>, vector<64x128xf32> -> vector<64x128xf32>
    %8 = arith.addf %5, %7 : vector<64x128xf32>
    %c0_8 = arith.constant 0 : index
    %c0_9 = arith.constant 0 : index
    %9 = vector.load %arg9[%c0_8, %c0_9] : memref<64x1xf32, #tpu.memory_space<vmem>>, vector<64x1xf32>
    %10 = vector.broadcast %9 : vector<64x1xf32> to vector<64x128xf32>
    %11 = arith.addf %8, %10 : vector<64x128xf32>
    %cst_10 = arith.constant 0.000000e+00 : f32
    %12 = vector.broadcast %cst_10 : f32 to vector<64x128xf32>
    %13 = arith.maximumf %11, %12 : vector<64x128xf32>
    %14 = vector.extract_strided_slice %13 {offsets = [0, 0], sizes = [32, 128], strides = [1, 1]} : vector<64x128xf32> to vector<32x128xf32>
    %15 = vector.extract_strided_slice %13 {offsets = [32, 0], sizes = [32, 128], strides = [1, 1]} : vector<64x128xf32> to vector<32x128xf32>
    %c0_11 = arith.constant 0 : index
    %c0_12 = arith.constant 0 : index
    %16 = vector.load %arg8[%c0_11, %c0_12] : memref<1x32xf32, #tpu.memory_space<vmem>>, vector<1x32xf32>
    %cst_13 = arith.constant dense<0.000000e+00> : vector<1x128xf32>
    %17 = tpu.matmul %16, %15, %cst_13 {dimension_numbers = #tpu.dot_dimension_numbers<[1], [0], [0], [1], [0, 0, 1, 1], [], []>} : vector<1x32xf32>, vector<32x128xf32>, vector<1x128xf32> -> vector<1x128xf32>
    %c0_14 = arith.constant 0 : index
    %c0_15 = arith.constant 0 : index
    %18 = vector.load %arg5[%c0_14, %c0_15] : memref<32x32xf32, #tpu.memory_space<vmem>>, vector<32x32xf32>
    %cst_16 = arith.constant dense<0.000000e+00> : vector<32x128xf32>
    %19 = tpu.matmul %18, %14, %cst_16 {dimension_numbers = #tpu.dot_dimension_numbers<[1], [0], [0], [1], [0, 0, 1, 1], [], []>} : vector<32x32xf32>, vector<32x128xf32>, vector<32x128xf32> -> vector<32x128xf32>
    %c0_17 = arith.constant 0 : index
    %c0_18 = arith.constant 0 : index
    %20 = vector.load %arg10[%c0_17, %c0_18] : memref<32x1xf32, #tpu.memory_space<vmem>>, vector<32x1xf32>
    %21 = vector.broadcast %20 : vector<32x1xf32> to vector<32x128xf32>
    %22 = arith.addf %19, %21 : vector<32x128xf32>
    %cst_19 = arith.constant 0.000000e+00 : f32
    %23 = vector.broadcast %cst_19 : f32 to vector<32x128xf32>
    %24 = arith.maximumf %22, %23 : vector<32x128xf32>
    %c0_20 = arith.constant 0 : index
    %c0_21 = arith.constant 0 : index
    %25 = vector.load %arg6[%c0_20, %c0_21] : memref<32x32xf32, #tpu.memory_space<vmem>>, vector<32x32xf32>
    %cst_22 = arith.constant dense<0.000000e+00> : vector<32x128xf32>
    %26 = tpu.matmul %25, %24, %cst_22 {dimension_numbers = #tpu.dot_dimension_numbers<[1], [0], [0], [1], [0, 0, 1, 1], [], []>} : vector<32x32xf32>, vector<32x128xf32>, vector<32x128xf32> -> vector<32x128xf32>
    %c0_23 = arith.constant 0 : index
    %c0_24 = arith.constant 0 : index
    %27 = vector.load %arg11[%c0_23, %c0_24] : memref<32x1xf32, #tpu.memory_space<vmem>>, vector<32x1xf32>
    %28 = vector.broadcast %27 : vector<32x1xf32> to vector<32x128xf32>
    %29 = arith.addf %26, %28 : vector<32x128xf32>
    %cst_25 = arith.constant 0.000000e+00 : f32
    %30 = vector.broadcast %cst_25 : f32 to vector<32x128xf32>
    %31 = arith.maximumf %29, %30 : vector<32x128xf32>
    %c0_26 = arith.constant 0 : index
    %c0_27 = arith.constant 0 : index
    %32 = vector.load %arg7[%c0_26, %c0_27] : memref<1x32xf32, #tpu.memory_space<vmem>>, vector<1x32xf32>
    %cst_28 = arith.constant dense<0.000000e+00> : vector<1x128xf32>
    %33 = tpu.matmul %32, %31, %cst_28 {dimension_numbers = #tpu.dot_dimension_numbers<[1], [0], [0], [1], [0, 0, 1, 1], [], []>} : vector<1x32xf32>, vector<32x128xf32>, vector<1x128xf32> -> vector<1x128xf32>
    %34 = arith.addf %33, %17 : vector<1x128xf32>
    %c0_29 = arith.constant 0 : index
    %c0_30 = arith.constant 0 : index
    %35 = memref.load %arg12[%c0_29, %c0_30] : memref<1x1xf32, #tpu.memory_space<smem>>
    %36 = vector.broadcast %35 : f32 to vector<1x128xf32>
    %37 = arith.addf %34, %36 : vector<1x128xf32>
    %c0_31 = arith.constant 0 : index
    %c0_32 = arith.constant 0 : index
    %38 = vector.load %arg13[%c0_31, %c0_32] : memref<1x128xf32, #tpu.memory_space<vmem>>, vector<1x128xf32>
    tpu.vector_store %arg13[%c0_31, %c0_32], %37 {strides = array<i32>} : memref<1x128xf32, #tpu.memory_space<vmem>>, vector<1x128xf32>,
    return
  }
  func.func @transform_0(%arg0: i32) -> (i32, i32) {
    %c0_i32 = arith.constant 0 : i32
    %c0_i32_0 = arith.constant 0 : i32
    return %arg0, %c0_i32 : i32, i32
  }
  func.func @transform_1(%arg0: i32) -> (i32, i32) {
    %c0_i32 = arith.constant 0 : i32
    %c0_i32_0 = arith.constant 0 : i32
    return %arg0, %c0_i32 : i32, i32
  }
  func.func @transform_2(%arg0: i32) -> (i32, i32) {
    %c0_i32 = arith.constant 0 : i32
    %c0_i32_0 = arith.constant 0 : i32
    %c0_i32_1 = arith.constant 0 : i32
    return %c0_i32, %c0_i32_0 : i32, i32
  }
  func.func @transform_3(%arg0: i32) -> (i32, i32) {
    %c0_i32 = arith.constant 0 : i32
    %c0_i32_0 = arith.constant 0 : i32
    %c0_i32_1 = arith.constant 0 : i32
    return %c0_i32, %c0_i32_0 : i32, i32
  }
  func.func @transform_4(%arg0: i32) -> (i32, i32) {
    %c0_i32 = arith.constant 0 : i32
    %c0_i32_0 = arith.constant 0 : i32
    %c0_i32_1 = arith.constant 0 : i32
    return %c0_i32, %c0_i32_0 : i32, i32
  }
  func.func @transform_5(%arg0: i32) -> (i32, i32) {
    %c0_i32 = arith.constant 0 : i32
    %c0_i32_0 = arith.constant 0 : i32
    %c0_i32_1 = arith.constant 0 : i32
    return %c0_i32, %c0_i32_0 : i32, i32
  }
  func.func @transform_6(%arg0: i32) -> (i32, i32) {
    %c0_i32 = arith.constant 0 : i32
    %c0_i32_0 = arith.constant 0 : i32
    %c0_i32_1 = arith.constant 0 : i32
    return %c0_i32, %c0_i32_0 : i32, i32
  }
  func.func @transform_7(%arg0: i32) -> (i32, i32) {
    %c0_i32 = arith.constant 0 : i32
    %c0_i32_0 = arith.constant 0 : i32
    %c0_i32_1 = arith.constant 0 : i32
    return %c0_i32, %c0_i32_0 : i32, i32
  }
  func.func @transform_8(%arg0: i32) -> (i32, i32) {
    %c0_i32 = arith.constant 0 : i32
    %c0_i32_0 = arith.constant 0 : i32
    %c0_i32_1 = arith.constant 0 : i32
    return %c0_i32, %c0_i32_0 : i32, i32
  }
  func.func @transform_9(%arg0: i32) -> (i32, i32) {
    %c0_i32 = arith.constant 0 : i32
    %c0_i32_0 = arith.constant 0 : i32
    %c0_i32_1 = arith.constant 0 : i32
    return %c0_i32, %c0_i32_0 : i32, i32
  }
  func.func @transform_10(%arg0: i32) -> (i32, i32) {
    %c0_i32 = arith.constant 0 : i32
    %c0_i32_0 = arith.constant 0 : i32
    %c0_i32_1 = arith.constant 0 : i32
    return %c0_i32, %c0_i32_0 : i32, i32
  }
  func.func @transform_11(%arg0: i32) -> (i32, i32) {
    %c0_i32 = arith.constant 0 : i32
    %c0_i32_0 = arith.constant 0 : i32
    %c0_i32_1 = arith.constant 0 : i32
    return %c0_i32, %c0_i32_0 : i32, i32
  }
  func.func @transform_12(%arg0: i32) -> (i32, i32) {
    %c0_i32 = arith.constant 0 : i32
    %c0_i32_0 = arith.constant 0 : i32
    return %c0_i32, %arg0 : i32, i32
  }
}

</mosaic_0001>

<bundles_post_ra>
// kernel: squeeze.1
= control target key start
LH: loop header
LB: loop body
LE: loop exit
PB: predicated region body
PF: predicated region fallthrough
CT: control target
= control target key end

     0   :  { %s80_s0 = inlined_call_operand.vmem [shape: f32[8], index: 0, kind: input, shape index: {}]   ;;  %s81_s1 = inlined_call_operand.hbm [shape: f32[2,4,1], index: 1, kind: output, shape index: {}]  }
   0x1   :  { %v5_v0 = vld [vmem:[%s80_s0] sm:$0x1] }
   0x2   :  { %2 = vsyncpa [#allocation1], 0  ;;  %6 = vst [vmem:[#allocation3] sm:$0x1] %v5_v0  ;;  %vm8_vm0 = vcmask 31744   ;;  %s62_s0 = smov 124  }
   0x3   :  { %s63_s8 = smov [#allocation0]   ;;  %s27_s1 = sshll.u32 %s81_s1, 4  ;;  %s28_s1 = int_to_ptr.hbm [resolvable:$true] %s27_s1 }
   0x4   :  { %s25_s9 = sshll.u32 %s63_s8, 4  ;;  %s26_s9 = int_to_ptr.vmem [resolvable:$true] %s25_s9 }
   0x9   :  { %v10_v1 = vld [vmem:[#allocation3] sm:$0x1]  }
   0xa   :  { %v7_v2 = vld [vmem:[#allocation3] sm:$0x1]   ;;  %11 = vrot.lane.b32.xlu0 %v10_v1, %s62_s0 }
   0xb   :  { %9 = vst.msk [vmem:[#allocation2] sm:$0x1] %vm8_vm0, %v7_v2  }
  0x7c   :  { %v12_v3 = vpop.permute.xlu0 %11  }
  0x7d   :  { %15 = vst.msk [vmem:[#allocation2 + $0x1] sm:$0x1] %vm8_vm0, %v12_v3  }
  0x84   :  { %v18_v4 = vld [vmem:[#allocation2] sm:$0x3] }
  0x85   :  { %21 = vst [vmem:[#allocation0] sm:$0x3] %v18_v4 }
  0x86   :  { %30 = dma.vmem_to_hbm [thread:$0]  %s26_s9, 32, %s28_s1, [#allocation1]  }
  0x87   :  { %60 = dma.done.wait [#allocation1], 32  }
  0x88   :  { %61 = vsyncadd [#allocation1], 4294967264 }
  0x89   :  { %33 = vsyncpa [#allocation1], 1 }

// kernel: multi_head_qmixer_central_ff.1
= control target key start
LH: loop header
LB: loop body
LE: loop exit
PB: predicated region body
PF: predicated region fallthrough
CT: control target
= control target key end

     0   :  { %vm90_vm0 = vcmask 31744   ;;  %vm204_vm1 = vcmask 130048   ;;  %v647_v15 = vmov 0   ;;  %vm383_vm2 = vcmask 261120   ;;  %s999_s1 = inlined_call_operand.vmem [shape: f32[128,4], index: 1, kind: input, shape index: {}]   ;;  %s1000_s0 = inlined_call_operand.vmem [shape: f32[128,16], index: 0, kind: input, shape index: {}]   ;;  %s1001_s8 = inlined_call_operand.vmem [shape: f32[64,1], index: 8, kind: input, shape index: {}]   ;;  %s1002_s9 = inlined_call_operand.vmem [shape: f32[32,1], index: 9, kind: input, shape index: {}]   ;;  %s1003_s10 = inlined_call_operand.vmem [shape: f32[32,1], index: 10, kind: input, shape index: {}]   ;;  %s1004_s3 = inlined_call_operand.vmem [shape: f32[64,4], index: 3, kind: input, shape index: {}]   ;;  %s1005_s2 = inlined_call_operand.vmem [shape: f32[64,16], index: 2, kind: input, shape index: {}]   ;;  %s1006_s4 = inlined_call_operand.vmem [shape: f32[32,32], index: 4, kind: input, shape index: {}]   ;;  %s1007_s7 = inlined_call_operand.vmem [shape: f32[1,32], index: 7, kind: input, shape index: {}]   ;;  %s1008_s5 = inlined_call_operand.vmem [shape: f32[32,32], index: 5, kind: input, shape index: {}]   ;;  %s1009_s6 = inlined_call_operand.vmem [shape: f32[1,32], index: 6, kind: input, shape index: {}]   ;;  %s1010_s11 = inlined_call_operand.<no memory space> [shape: f32[1,1], index: 11, kind: input, shape index: {}]   ;;  %s1011_s12 = inlined_call_operand.vmem [shape: f32[1,128], index: 12, kind: output, shape index: {}]  }
   0x1   :  { %v73_v0 = vld [vmem:[%s999_s1 + $0x78] sm:$0xff]  ;;  %v72_v2 = vld [vmem:[%s999_s1 + $0x70] sm:$0xff]  ;;  %v71_v4 = vld [vmem:[%s999_s1 + $0x68] sm:$0xff]  ;;  %644 = vset.pattern.permute.xlu0 %v647_v15  ;;  %645 = vset.pattern.permute.xlu1 %v647_v15 }
   0x2   :  { %v57_v1 = vld [vmem:[%s1000_s0 + $0x78] sm:$0xff]  ;;  %585 = vmatpush.xpose.msk.msra.mxu0 %vm90_vm0, %v73_v0  ;;  %v56_v3 = vld [vmem:[%s1000_s0 + $0x70] sm:$0xff]  ;;  %v55_v5 = vld [vmem:[%s1000_s0 + $0x68] sm:$0xff]  ;;  %646 = vset.pattern.permute.xlu2 %v647_v15 }
   0x3   :  { %609 = vmatpush.xpose.msk.msra.mxu1 %vm204_vm1, %v57_v1  ;;  %v70_v6 = vld [vmem:[%s999_s1 + $0x60] sm:$0xff]  ;;  %v69_v8 = vld [vmem:[%s999_s1 + $0x58] sm:$0xff]  ;;  %v68_v10 = vld [vmem:[%s999_s1 + $0x50] sm:$0xff] }
   0x4   :  { %v54_v7 = vld [vmem:[%s1000_s0 + $0x60] sm:$0xff]  ;;  %v53_v9 = vld [vmem:[%s1000_s0 + $0x58] sm:$0xff]  ;;  %v52_v11 = vld [vmem:[%s1000_s0 + $0x50] sm:$0xff] }
   0x5   :  { %v321_v12 = vld [vmem:[%s1001_s8 + $0x18] sm:$0xff]  ;;  %v67_v13 = vld [vmem:[%s999_s1 + $0x48] sm:$0xff]  ;;  %v66_v16 = vld [vmem:[%s999_s1 + $0x40] sm:$0xff] }
   0x6   :  { %586 = vmatpush.xpose.msk.msra.mxu0 %vm90_vm0, %v72_v2  ;;  %v51_v14 = vld [vmem:[%s1000_s0 + $0x48] sm:$0xff]  ;;  %343 = vperm.xlu0 %644, %v321_v12   ;;  %v50_v17 = vld [vmem:[%s1000_s0 + $0x40] sm:$0xff]  ;;  %v320_v18 = vld [vmem:[%s1001_s8 + $0x10] sm:$0xff] }
   0x7   :  { %610 = vmatpush.xpose.msk.msra.mxu1 %vm204_vm1, %v56_v3  ;;  %v65_v19 = vld [vmem:[%s999_s1 + $0x38] sm:$0xff]  ;;  %v319_v21 = vld [vmem:[%s1001_s8 + $0x8] sm:$0xff]  ;;  %v64_v22 = vld [vmem:[%s999_s1 + $0x30] sm:$0xff] }
   0x8   :  { %v49_v20 = vld [vmem:[%s1000_s0 + $0x38] sm:$0xff]  ;;  %v48_v23 = vld [vmem:[%s1000_s0 + $0x30] sm:$0xff]  ;;  %333 = vperm.xlu1 %645, %v319_v21   ;;  %v323_v24 = vld [vmem:[%s1001_s8 + $0x28] sm:$0xff] }
   0x9   :  { %v63_v25 = vld [vmem:[%s999_s1 + $0x28] sm:$0xff]  ;;  %v318_v27 = vld [vmem:[%s1001_s8] sm:$0xff]  ;;  %v413_v30 = vld [vmem:[%s1002_s9 + $0x10] sm:$0xff] }
   0xa   :  { %587 = vmatpush.xpose.msk.msra.mxu0 %vm90_vm0, %v71_v4  ;;  %v47_v26 = vld [vmem:[%s1000_s0 + $0x28] sm:$0xff]  ;;  %v62_v28 = vld [vmem:[%s999_s1 + $0x20] sm:$0xff]  ;;  %v61_v31 = vld [vmem:[%s999_s1 + $0x18] sm:$0xff] }
   0xb   :  { %611 = vmatpush.xpose.msk.msra.mxu1 %vm204_vm1, %v55_v5  ;;  %v46_v29 = vld [vmem:[%s1000_s0 + $0x20] sm:$0xff]  ;;  %v45_v32 = vld [vmem:[%s1000_s0 + $0x18] sm:$0xff]  ;;  %v60_v34 = vld [vmem:[%s999_s1 + $0x10] sm:$0xff] }
   0xc   :  { %v322_v33 = vld [vmem:[%s1001_s8 + $0x20] sm:$0xff]  ;;  %v44_v35 = vld [vmem:[%s1000_s0 + $0x10] sm:$0xff]  ;;  %v487_v36 = vld [vmem:[%s1003_s10 + $0x18] sm:$0xff] }
   0xd   :  { %v59_v37 = vld [vmem:[%s999_s1 + $0x8] sm:$0xff]  ;;  %v58_v40 = vld [vmem:[%s999_s1] sm:$0xff]  ;;  %v486_v45 = vld [vmem:[%s1003_s10 + $0x10] sm:$0xff] }
   0xe   :  { %588 = vmatpush.xpose.msk.msra.mxu0 %vm90_vm0, %v70_v6  ;;  %338 = vperm.xlu0 %644, %v320_v18   ;;  %v43_v38 = vld [vmem:[%s1000_s0 + $0x8] sm:$0xff]  ;;  %v42_v41 = vld [vmem:[%s1000_s0] sm:$0xff]  ;;  %v84_v48 = vld [vmem:[%s1004_s3 + $0x10] sm:$0xff] }
   0xf   :  { %612 = vmatpush.xpose.msk.msra.mxu1 %vm204_vm1, %v54_v7  ;;  %v412_v39 = vld [vmem:[%s1002_s9 + $0x8] sm:$0xff]  ;;  %v484_v42 = vld [vmem:[%s1003_s10] sm:$0xff]  ;;  %v76_v49 = vld [vmem:[%s1005_s2 + $0x10] sm:$0xff] }
  0x10   :  { %328 = vperm.xlu1 %645, %v318_v27   ;;  %v82_v43 = vld [vmem:[%s1004_s3] sm:$0xff]  ;;  %v83_v46 = vld [vmem:[%s1004_s3 + $0x8] sm:$0xff]  ;;  %v85_v50 = vld [vmem:[%s1004_s3 + $0x18] sm:$0xff] }
  0x11   :  { %v74_v44 = vld [vmem:[%s1005_s2] sm:$0xff]  ;;  %v75_v47 = vld [vmem:[%s1005_s2 + $0x8] sm:$0xff]  ;;  %v77_v51 = vld [vmem:[%s1005_s2 + $0x18] sm:$0xff] }
  0x12   :  { %589 = vmatpush.xpose.msk.msra.mxu0 %vm90_vm0, %v69_v8  ;;  %v325_v52 = vld [vmem:[%s1001_s8 + $0x38] sm:$0xff]  ;;  %v86_v53 = vld [vmem:[%s1004_s3 + $0x20] sm:$0xff]  ;;  %v324_v55 = vld [vmem:[%s1001_s8 + $0x30] sm:$0xff] }
  0x13   :  { %613 = vmatpush.xpose.msk.msra.mxu1 %vm204_vm1, %v53_v9  ;;  %363 = vperm.xlu2 %646, %v325_v52   ;;  %v78_v54 = vld [vmem:[%s1005_s2 + $0x20] sm:$0xff]  ;;  %v87_v56 = vld [vmem:[%s1004_s3 + $0x28] sm:$0xff]  ;;  %v88_v58 = vld [vmem:[%s1004_s3 + $0x30] sm:$0xff] }
  0x14   :  { %v79_v57 = vld [vmem:[%s1005_s2 + $0x28] sm:$0xff]  ;;  %v80_v59 = vld [vmem:[%s1005_s2 + $0x30] sm:$0xff]  ;;  %v89_v60 = vld [vmem:[%s1004_s3 + $0x38] sm:$0xff] }
  0x15   :  { %v81_v61 = vld [vmem:[%s1005_s2 + $0x38] sm:$0xff] }
  0x16   :  { %590 = vmatpush.xpose.msk.msra.mxu0 %vm90_vm0, %v68_v10  ;;  %353 = vperm.xlu0 %644, %v323_v24   ;;  %v407_v24 = vld [vmem:[%s1006_s4] sm:$0xff] }
  0x17   :  { %614 = vmatpush.xpose.msk.msra.mxu1 %vm204_vm1, %v52_v11 }
  0x18   :  { %348 = vperm.xlu1 %645, %v322_v33   ;;  %v485_v33 = vld [vmem:[%s1003_s10 + $0x8] sm:$0xff] }
  0x1a   :  { %591 = vmatpush.xpose.msk.msra.mxu0 %vm90_vm0, %v67_v13 }
  0x1b   :  { %615 = vmatpush.xpose.msk.msra.mxu1 %vm204_vm1, %v51_v14  ;;  %358 = vperm.xlu2 %646, %v324_v55  }
  0x1e   :  { %592 = vmatpush.xpose.msk.msra.mxu0 %vm90_vm0, %v66_v16  ;;  %427 = vperm.xlu0 %644, %v413_v30  }
  0x1f   :  { %616 = vmatpush.xpose.msk.msra.mxu1 %vm204_vm1, %v50_v17 }
  0x20   :  { %422 = vperm.xlu1 %645, %v412_v39  }
  0x22   :  { %593 = vmatpush.xpose.msk.msra.mxu0 %vm90_vm0, %v65_v19 }
  0x23   :  { %617 = vmatpush.xpose.msk.msra.mxu1 %vm204_vm1, %v49_v20 }
  0x26   :  { %594 = vmatpush.xpose.msk.msra.mxu0 %vm90_vm0, %v64_v22  ;;  %505 = vperm.xlu0 %644, %v487_v36  }
  0x27   :  { %618 = vmatpush.xpose.msk.msra.mxu1 %vm204_vm1, %v48_v23 }
  0x28   :  { %500 = vperm.xlu1 %645, %v486_v45  }
  0x2a   :  { %595 = vmatpush.xpose.msk.msra.mxu0 %vm90_vm0, %v63_v25  ;;  %v414_v25 = vld [vmem:[%s1002_s9 + $0x18] sm:$0xff] }
  0x2b   :  { %619 = vmatpush.xpose.msk.msra.mxu1 %vm204_vm1, %v47_v26  ;;  %432 = vperm.xlu2 %646, %v414_v25  }
  0x2e   :  { %596 = vmatpush.xpose.msk.msra.mxu0 %vm90_vm0, %v62_v28  ;;  %490 = vperm.xlu0 %644, %v484_v42   ;;  %v411_v28 = vld [vmem:[%s1002_s9] sm:$0xff] }
  0x2f   :  { %620 = vmatpush.xpose.msk.msra.mxu1 %vm204_vm1, %v46_v29  ;;  %v408_v29 = vld [vmem:[%s1006_s4 + $0x8] sm:$0xff] }
  0x32   :  { %597 = vmatpush.xpose.msk.msra.mxu0 %vm90_vm0, %v61_v31 }
  0x33   :  { %621 = vmatpush.xpose.msk.msra.mxu1 %vm204_vm1, %v45_v32  ;;  %417 = vperm.xlu2 %646, %v411_v28  }
  0x36   :  { %598 = vmatpush.xpose.msk.msra.mxu0 %vm90_vm0, %v60_v34  ;;  %v409_v34 = vld [vmem:[%s1006_s4 + $0x10] sm:$0xff] }
  0x37   :  { %622 = vmatpush.xpose.msk.msra.mxu1 %vm204_vm1, %v44_v35 }
  0x3a   :  { %599 = vmatpush.xpose.msk.msra.mxu0 %vm90_vm0, %v59_v37 }
  0x3b   :  { %623 = vmatpush.xpose.msk.msra.mxu1 %vm204_vm1, %v43_v38  ;;  %495 = vperm.xlu2 %646, %v485_v33  }
  0x3e   :  { %600 = vmatpush.xpose.msk.msra.mxu0 %vm90_vm0, %v58_v40 }
  0x3f   :  { %624 = vmatpush.xpose.msk.msra.mxu1 %vm204_vm1, %v42_v41 }
  0x41   :  { %601 = vmatmul.msk.f32.vlgmr.msra.gmra.mxu0 %vm90_vm0, %v82_v43  ;;  %v410_v43 = vld [vmem:[%s1006_s4 + $0x18] sm:$0xff] }
  0x42   :  { %625 = vmatmul.msk.f32.vlgmr.msra.gmra.mxu1 %vm204_vm1, %v74_v44 }
  0x49   :  { %602 = vmatmul.msk.f32.gmra.mxu0 %vm90_vm0, %v83_v46 }
  0x4a   :  { %626 = vmatmul.msk.f32.gmra.mxu1 %vm204_vm1, %v75_v47 }
  0x51   :  { %603 = vmatmul.msk.f32.gmra.mxu0 %vm90_vm0, %v84_v48 }
  0x52   :  { %627 = vmatmul.msk.f32.gmra.mxu1 %vm204_vm1, %v76_v49 }
  0x59   :  { %604 = vmatmul.msk.f32.gmra.mxu0 %vm90_vm0, %v85_v50 }
  0x5a   :  { %628 = vmatmul.msk.f32.gmra.mxu1 %vm204_vm1, %v77_v51 }
  0x61   :  { %605 = vmatmul.msk.f32.gmra.mxu0 %vm90_vm0, %v86_v53  ;;  %v382_v53 = vld [vmem:[%s1007_s7] sm:$0x1] }
  0x62   :  { %629 = vmatmul.msk.f32.gmra.mxu1 %vm204_vm1, %v78_v54 }
  0x69   :  { %606 = vmatmul.msk.f32.gmra.mxu0 %vm90_vm0, %v87_v56 }
  0x6a   :  { %630 = vmatmul.msk.f32.gmra.mxu1 %vm204_vm1, %v79_v57 }
  0x6d   :  { %v364_v30 = vpop.permute.xlu2 %363 }
  0x71   :  { %607 = vmatmul.msk.f32.gmra.mxu0 %vm90_vm0, %v88_v58 }
  0x72   :  { %631 = vmatmul.msk.f32.gmra.mxu1 %vm204_vm1, %v80_v59 }
  0x75   :  { %v359_v36 = vpop.permute.xlu2 %358 }
  0x78   :  { %v344_v2 = vpop.permute.xlu0 %343 }
  0x79   :  { %608 = vmatmul.msk.f32.gmra.mxu0 %vm90_vm0, %v89_v60 }
  0x7a   :  { %632 = vmatmul.msk.f32.gmra.mxu1 %vm204_vm1, %v81_v61  ;;  %v334_v5 = vpop.permute.xlu1 %333 }
  0x80   :  { %v339_v11 = vpop.permute.xlu0 %338 }
  0x82   :  { %v329_v17 = vpop.permute.xlu1 %328 }
  0x85   :  { %v433_v57 = vpop.permute.xlu2 %432 }
  0x88   :  { %v354_v45 = vpop.permute.xlu0 %353 }
  0x8a   :  { %v349_v49 = vpop.permute.xlu1 %348 }
  0x90   :  { %v428_v58 = vpop.permute.xlu0 %427 }
  0xbe   :  { %v180_v62 = vpop.f32.mrf.mxu0 }
  0xbf   :  { %v294_v63 = vpop.f32.mrf.mxu1 }
  0xc0   :  { %v295_v12 = vadd.f32 %v294_v63, %v180_v62  ;;  %v423_v62 = vpop.permute.xlu1 %422 }
  0xc2   :  { %v366_v19 = vadd.f32 %v329_v17, %v295_v12 }
  0xc4   :  { %v374_v23 = vmax.f32 %v366_v19, 0.0 }
  0xc6   :  { %v183_v0 = vpop.f32.mrf.mxu0 }
  0xc7   :  { %v297_v1 = vpop.f32.mrf.mxu1 }
  0xc8   :  { %v298_v9 = vadd.f32 %v297_v1, %v183_v0  ;;  %v418_v1 = vpop.permute.xlu2 %417 }
  0xca   :  { %v367_v16 = vadd.f32 %v334_v5, %v298_v9  ;;  %v483_v9 = vld [vmem:[%s1008_s5 + $0x18] sm:$0xff] }
  0xcc   :  { %v375_v22 = vmax.f32 %v367_v16, 0.0 }
  0xce   :  { %v186_v3 = vpop.f32.mrf.mxu0 }
  0xcf   :  { %v300_v4 = vpop.f32.mrf.mxu1 }
  0xd0   :  { %v301_v6 = vadd.f32 %v300_v4, %v186_v3  ;;  %v496_v19 = vpop.permute.xlu2 %495 }
  0xd2   :  { %v368_v14 = vadd.f32 %v339_v11, %v301_v6  ;;  %v480_v6 = vld [vmem:[%s1008_s5] sm:$0xff] }
  0xd4   :  { %v376_v18 = vmax.f32 %v368_v14, 0.0  ;;  %v506_v14 = vpop.permute.xlu0 %505 }
  0xd6   :  { %v189_v7 = vpop.f32.mrf.mxu0 }
  0xd7   :  { %v303_v8 = vpop.f32.mrf.mxu1 }
  0xd8   :  { %v304_v10 = vadd.f32 %v303_v8, %v189_v7  ;;  %v481_v7 = vld [vmem:[%s1008_s5 + $0x8] sm:$0xff]  ;;  %v482_v8 = vld [vmem:[%s1008_s5 + $0x10] sm:$0xff] }
  0xda   :  { %v369_v13 = vadd.f32 %v344_v2, %v304_v10 }
  0xdc   :  { %v377_v15 = vmax.f32 %v369_v13, 0.0 }
  0xde   :  { %459 = vmatpush.msra.mxu3 %v377_v15  ;;  %v192_v20 = vpop.f32.mrf.mxu0  ;;  %v501_v15 = vpop.permute.xlu1 %500 }
  0xdf   :  { %v306_v21 = vpop.f32.mrf.mxu1 }
  0xe0   :  { %460 = vmatpush.msra.mxu3 %v376_v18  ;;  %v307_v42 = vadd.f32 %v306_v21, %v192_v20 }
  0xe2   :  { %461 = vmatpush.msra.mxu3 %v375_v22  ;;  %v370_v50 = vadd.f32 %v349_v49, %v307_v42  ;;  %v491_v22 = vpop.permute.xlu0 %490 }
  0xe4   :  { %462 = vmatpush.msra.mxu3 %v374_v23  ;;  %v378_v52 = vmax.f32 %v370_v50, 0.0 }
  0xe5   :  { %634 = vmatmul.msk.f32.vlgmr.msra.gmra.mxu3 %vm383_vm2, %v407_v24 }
  0xe6   :  { %v195_v26 = vpop.f32.mrf.mxu0 }
  0xe7   :  { %v309_v27 = vpop.f32.mrf.mxu1 }
  0xe8   :  { %v310_v39 = vadd.f32 %v309_v27, %v195_v26  ;;  %v553_v27 = vld [vmem:[%s1009_s6] sm:$0x1] }
  0xea   :  { %v371_v48 = vadd.f32 %v354_v45, %v310_v39 }
  0xec   :  { %v379_v51 = vmax.f32 %v371_v48, 0.0 }
  0xed   :  { %635 = vmatmul.msk.f32.gmra.mxu3 %vm383_vm2, %v408_v29  ;;  %v578_v29 = vstv %s1010_s11 }
  0xee   :  { %v198_v31 = vpop.f32.mrf.mxu0 }
  0xef   :  { %v312_v32 = vpop.f32.mrf.mxu1 }
  0xf0   :  { %v313_v35 = vadd.f32 %v312_v32, %v198_v31 }
  0xf2   :  { %v372_v41 = vadd.f32 %v359_v36, %v313_v35 }
  0xf4   :  { %v380_v46 = vmax.f32 %v372_v41, 0.0 }
  0xf5   :  { %636 = vmatmul.msk.f32.gmra.mxu3 %vm383_vm2, %v409_v34 }
  0xf6   :  { %v201_v37 = vpop.f32.mrf.mxu0 }
  0xf7   :  { %v315_v38 = vpop.f32.mrf.mxu1 }
  0xf8   :  { %v316_v40 = vadd.f32 %v315_v38, %v201_v37 }
  0xfa   :  { %v373_v44 = vadd.f32 %v364_v30, %v316_v40 }
  0xfc   :  { %v381_v47 = vmax.f32 %v373_v44, 0.0 }
  0xfd   :  { %637 = vmatmul.msk.f32.gmra.mxu3 %vm383_vm2, %v410_v43 }
  0xfe   :  { %399 = vmatpush.msra.mxu2 %v381_v47 }
 0x100   :  { %400 = vmatpush.msra.mxu2 %v380_v46 }
 0x102   :  { %401 = vmatpush.msra.mxu2 %v379_v51 }
 0x104   :  { %402 = vmatpush.msra.mxu2 %v378_v52 }
 0x105   :  { %633 = vmatmul.msk.f32.vlgmr.msra.gmra.mxu2 %vm383_vm2, %v382_v53 }
 0x168   :  { %v464_v54 = vpop.f32.mrf.mxu3 }
 0x169   :  { %v465_v2 = vadd.f32 %v464_v54, %v418_v1 }
 0x16b   :  { %v476_v5 = vmax.f32 %v465_v2, 0.0 }
 0x170   :  { %v467_v55 = vpop.f32.mrf.mxu3 }
 0x171   :  { %v468_v63 = vadd.f32 %v467_v55, %v423_v62 }
 0x173   :  { %v477_v4 = vmax.f32 %v468_v63, 0.0 }
 0x178   :  { %v470_v56 = vpop.f32.mrf.mxu3 }
 0x179   :  { %v471_v60 = vadd.f32 %v470_v56, %v428_v58 }
 0x17b   :  { %v478_v3 = vmax.f32 %v471_v60, 0.0 }
 0x180   :  { %v473_v59 = vpop.f32.mrf.mxu3 }
 0x181   :  { %v474_v61 = vadd.f32 %v473_v59, %v433_v57 }
 0x183   :  { %v479_v0 = vmax.f32 %v474_v61, 0.0 }
 0x185   :  { %532 = vmatpush.msrb.mxu2 %v479_v0 }
 0x187   :  { %533 = vmatpush.msrb.mxu2 %v478_v3 }
 0x188   :  { %v404_v10 = vpop.f32.mrf.mxu2 }
 0x189   :  { %534 = vmatpush.msrb.mxu2 %v477_v4 }
 0x18b   :  { %535 = vmatpush.msrb.mxu2 %v476_v5 }
 0x18c   :  { %638 = vmatmul.msk.f32.vlgmr.msrb.gmra.mxu2 %vm383_vm2, %v480_v6 }
 0x194   :  { %639 = vmatmul.msk.f32.gmra.mxu2 %vm383_vm2, %v481_v7 }
 0x19c   :  { %640 = vmatmul.msk.f32.gmra.mxu2 %vm383_vm2, %v482_v8 }
 0x1a4   :  { %641 = vmatmul.msk.f32.gmra.mxu2 %vm383_vm2, %v483_v9 }
 0x20f   :  { %v537_v11 = vpop.f32.mrf.mxu2 }
 0x210   :  { %v538_v23 = vadd.f32 %v537_v11, %v491_v22 }
 0x212   :  { %v549_v26 = vmax.f32 %v538_v23, 0.0 }
 0x217   :  { %v540_v12 = vpop.f32.mrf.mxu2 }
 0x218   :  { %v541_v20 = vadd.f32 %v540_v12, %v496_v19 }
 0x21a   :  { %v550_v25 = vmax.f32 %v541_v20, 0.0 }
 0x21f   :  { %v543_v13 = vpop.f32.mrf.mxu2 }
 0x220   :  { %v544_v17 = vadd.f32 %v543_v13, %v501_v15 }
 0x222   :  { %v551_v24 = vmax.f32 %v544_v17, 0.0 }
 0x227   :  { %v546_v16 = vpop.f32.mrf.mxu2 }
 0x228   :  { %v547_v18 = vadd.f32 %v546_v16, %v506_v14 }
 0x22a   :  { %v552_v21 = vmax.f32 %v547_v18, 0.0 }
 0x22c   :  { %569 = vmatpush.msrb.mxu3 %v552_v21 }
 0x22e   :  { %570 = vmatpush.msrb.mxu3 %v551_v24 }
 0x230   :  { %571 = vmatpush.msrb.mxu3 %v550_v25 }
 0x232   :  { %572 = vmatpush.msrb.mxu3 %v549_v26 }
 0x233   :  { %642 = vmatmul.msk.f32.vlgmr.msrb.gmra.mxu3 %vm383_vm2, %v553_v27 }
 0x2b6   :  { %v574_v28 = vpop.f32.mrf.mxu3 }
 0x2b7   :  { %v575_v30 = vadd.f32 %v574_v28, %v404_v10 }
 0x2b9   :  { %v579_v31 = vadd.f32 %v578_v29, %v575_v30 }
 0x2bb   :  { %580 = vst [vmem:[%s1011_s12] sm:$0x1] %v579_v31 }

</bundles_post_ra>
